<compile_context>
chip_gen: v7x
topology: tpu7x:2x2x1
jax: 0.10.0
libtpu: 0.0.40
codegen_flags: <defaults>
</compile_context>

<pallas_src>
import jax
import jax.numpy as jnp
from jax.experimental import pallas as pl
from jax.experimental.pallas import tpu as pltpu


def _transform_z_conv_kernel(z_ref, o_ref):
    # z_ref: (ROWS, 1)    — one latent value per row (VMEM)
    # o_ref: (ROWS, H*W)  — lane-dense broadcast output tile (VMEM)
    o_ref[...] = jnp.broadcast_to(z_ref[...], o_ref.shape)


def _sublane_multiple(dtype):
    """Packed sublane tile height: 8 for 32-bit, 16 for bf16, 32 for 8-bit."""
    itemsize = jnp.dtype(dtype).itemsize
    return 8 * max(1, 4 // itemsize)


def _round_up(x, m):
    return ((x + m - 1) // m) * m


def _pick_rows(total_rows, row_bytes, sublane_mult, target_tile_bytes):
    """Fixed row tile (~target_tile_bytes of output), dtype-sublane aligned.

    No divisor search: the grid uses pl.cdiv and the ragged last block is
    masked by Pallas."""
    rows = max(sublane_mult, target_tile_bytes // max(row_bytes, 1))
    rows -= rows % sublane_mult
    rows = max(rows, sublane_mult)
    # Guarantee >= 2 grid steps when there is enough work so the "parallel"
    # axis can be split across v7x's two TensorCores.
    if rows >= total_rows and total_rows > sublane_mult:
        rows = max(sublane_mult,
                   _round_up(pl.cdiv(total_rows, 2), sublane_mult))
    # Never request a block taller than the (padded) array extent.
    rows = min(rows, _round_up(total_rows, sublane_mult))
    return rows


def transform_z_conv(x, spatial=(16, 16), *, target_tile_bytes=4 << 20,
                     min_pallas_bytes=1 << 20):
    """x: [N, Z]  ->  [N, Z, H, W] with out[n, c, h, w] == x[n, c]."""
    N, Z = x.shape
    H, W = spatial
    HW = H * W
    total = N * Z
    itemsize = jnp.dtype(x.dtype).itemsize
    out_bytes = total * HW * itemsize

    # Small-problem bypass: pallas_call launch + grid prologue would dominate.
    if out_bytes < min_pallas_bytes:
        return jnp.broadcast_to(x[:, :, None, None], (N, Z, H, W))

    sub = _sublane_multiple(x.dtype)
    rows = _pick_rows(total, HW * itemsize, sub, target_tile_bytes)
    grid = (pl.cdiv(total, rows),)

    x_flat = x.reshape(total, 1)  # free, row-major compatible

    out_flat = pl.pallas_call(
        _transform_z_conv_kernel,
        out_shape=jax.ShapeDtypeStruct((total, HW), x.dtype),
        grid_spec=pl.GridSpec(
            grid=grid,
            in_specs=[pl.BlockSpec((rows, 1), lambda i: (i, 0))],
            out_specs=pl.BlockSpec((rows, HW), lambda i: (i, 0)),
        ),
        compiler_params=pltpu.CompilerParams(
            dimension_semantics=("parallel",),
            vmem_limit_bytes=32 << 20,
        ),
        cost_estimate=pl.CostEstimate(
            flops=0,
            transcendentals=0,
            bytes_accessed=total * (HW + 1) * itemsize,
        ),
    )(x_flat)

    # Free reshape back to NCHW.
    return out_flat.reshape(N, Z, H, W)


def _reference(x, spatial=(16, 16)):
    N, Z = x.shape
    H, W = spatial
    return jnp.broadcast_to(x[:, :, None, None], (N, Z, H, W))


if __name__ == "__main__":
    key = jax.random.PRNGKey(0)
    H, W = 16, 16

    # 1) Tiny canonical shape, forced through the Pallas kernel.
    N, Z = 2, 4
    x = jax.random.normal(key, (N, Z), dtype=jnp.float32)
    out = jax.block_until_ready(
        transform_z_conv(x, spatial=(H, W), min_pallas_bytes=0))
    ref = _reference(x, (H, W))
    assert out.shape == (N, Z, H, W)
    assert out.dtype == x.dtype
    assert bool(jnp.array_equal(out, ref)), "mismatch (tiny f32)"

    # 2) Medium f32 with a ragged (masked) last block and a 2-step grid.
    k2, k3 = jax.random.split(key)
    N2, Z2 = 5, 403   # total = 2015: not a multiple of 8 -> masked last block
    x2 = jax.random.normal(k2, (N2, Z2), dtype=jnp.float32)
    out2 = jax.block_until_ready(transform_z_conv(x2, spatial=(H, W)))
    assert bool(jnp.array_equal(out2, _reference(x2, (H, W)))), "mismatch (f32 ragged)"

    # 3) Medium bf16: exercises dtype-aligned (16-row) sublane tiling.
    N3, Z3 = 5, 500
    x3 = jax.random.normal(k3, (N3, Z3), dtype=jnp.float32).astype(jnp.bfloat16)
    out3 = jax.block_until_ready(transform_z_conv(x3, spatial=(H, W)))
    assert out3.dtype == jnp.bfloat16
    assert bool(jnp.array_equal(out3, _reference(x3, (H, W)))), "mismatch (bf16 ragged)"

    print("KERNEL_OK")
</pallas_src>

<mosaic_0001>
module attributes {stable_mosaic.version = 11 : i64} {
  func.func @_transform_z_conv_kernel(%arg0: i32, %arg1: memref<8x1xf32, #tpu.memory_space<vmem>>, %arg2: memref<8x256xf32, #tpu.memory_space<vmem>>) attributes {dimension_semantics = [#tpu.dimension_semantics<parallel>], iteration_bounds = array<i64: 1>, scalar_prefetch = 0 : i64, scratch_operands = 0 : i64, tpu.core_type = #tpu.core_type<tc>, window_params = [{transform_indices = @transform_0, window_bounds = array<i64: 8, 1>}, {transform_indices = @transform_1, window_bounds = array<i64: 8, 256>}]} {
    %c0 = arith.constant 0 : index
    %c0_0 = arith.constant 0 : index
    %0 = vector.load %arg1[%c0, %c0_0] : memref<8x1xf32, #tpu.memory_space<vmem>>, vector<8x1xf32>
    %1 = vector.shape_cast %0 : vector<8x1xf32> to vector<8x1xf32>
    %2 = vector.broadcast %1 : vector<8x1xf32> to vector<8x256xf32>
    %c0_1 = arith.constant 0 : index
    %c0_2 = arith.constant 0 : index
    %3 = vector.load %arg2[%c0_1, %c0_2] : memref<8x256xf32, #tpu.memory_space<vmem>>, vector<8x256xf32>
    tpu.vector_store %arg2[%c0_1, %c0_2], %2 {strides = array<i32>} : memref<8x256xf32, #tpu.memory_space<vmem>>, vector<8x256xf32>,
    return
  }
  func.func @transform_0(%arg0: i32) -> (i32, i32) {
    %c0_i32 = arith.constant 0 : i32
    %c0_i32_0 = arith.constant 0 : i32
    return %arg0, %c0_i32 : i32, i32
  }
  func.func @transform_1(%arg0: i32) -> (i32, i32) {
    %c0_i32 = arith.constant 0 : i32
    %c0_i32_0 = arith.constant 0 : i32
    return %arg0, %c0_i32 : i32, i32
  }
}

</mosaic_0001>

<bundles_post_ra>
// kernel: tpu_custom_call.1
= control target key start
LH: loop header
LB: loop body
LE: loop exit
PB: predicated region body
PF: predicated region fallthrough
CT: control target
= control target key end

     0   :  { %s85_s0 = inlined_call_operand.vmem [shape: f32[8,1], index: 0, kind: input, shape index: {}]   ;;  %s86_s1 = inlined_call_operand.hbm [shape: f32[8,256], index: 1, kind: output, shape index: {}]  }
   0x1   :  { %v9_v0 = vld [vmem:[%s85_s0] sm:$0xff] }
   0x2   :  { %6 = vsyncpa [#allocation3], 0  ;;  %v58_v1 = vmov 0   ;;  %s59_s8 = smov [#allocation2]  }
   0x3   :  { %33 = vset.pattern.permute.xlu0 %v58_v1  ;;  %s23_s9 = sshll.u32 %s59_s8, 4  ;;  %s24_s9 = int_to_ptr.vmem [resolvable:$true] %s23_s9 }
   0x4   :  { %12 = vperm.xlu0 %33, %v9_v0   ;;  %s34_s10 = scalar_lea.vmem %s24_s9, 256  ;;  %p39_p1 = scmp.lt.s32.totalorder %s24_s9, %s24_s9 }
   0x5   :  { %p35_p0 = scmp.ne.s32.totalorder %s24_s9, %s34_s10  ;;  %p40_p2 = scmp.lt.s32.totalorder %s34_s10, %s34_s10 }
   0x7   :  { %p41_p3 = por %p40_p2, %p39_p1 }
   0x9   :  { %p42_p4 = pnand %p41_p3, %p35_p0 }
  0x83   :  { %v13_v2 = vpop.permute.xlu0 %12 }
  0x84   :  { %15 = vst [vmem:[#allocation2] sm:$0xff] %v13_v2  ;;  %16 = vst [vmem:[#allocation2 + $0x8] sm:$0xff] %v13_v2 }
  0x85   :  { %45 = shalt.err (!%p42_p4)
}
  0x86   :  { %s46_s0 = scalar_lea.hbm %s86_s1, 256 }
  0x87   :  { %p47_p5 = scmp.ne.s32.totalorder %s86_s1, %s46_s0  ;;  %p50_p6 = scmp.lt.u32.totalorder %s46_s0, %s86_s1 }
  0x89   :  { %p52_p7 = pnand %p50_p6, %p47_p5 }
  0x8b   :  { %55 = shalt.err (!%p52_p7)
}
  0x8c   :  { %26 = dma.vmem_to_hbm [thread:$0]  %s24_s9, 256, %s86_s1, [#allocation3]  }
  0x8d   :  { %56 = dma.done.wait [#allocation3], 256  }
  0x8e   :  { %57 = vsyncadd [#allocation3], 4294967040 }
  0x8f   :  { %30 = vsyncpa [#allocation3], 1 }

</bundles_post_ra>
